<compile_context>
chip_gen: v6e
topology: v6e:2x2x1
jax: 0.10.0
libtpu: 0.0.40
codegen_flags: <defaults>
</compile_context>

<pallas_src>
import functools

import jax
import jax.numpy as jnp
from jax.experimental import pallas as pl
from jax.experimental.pallas import tpu as pltpu

D_IN = 512
HIDDEN = 100
OUT = 10
HIDDEN_P = 128   # lane-padded hidden width (multiple of 128)
OUT_P = 128      # lane-padded output width  (multiple of 128)


def _round_up(n, m):
    return ((n + m - 1) // m) * m


def classifier_kernel(x_ref, w1_ref, b1_ref, w2_ref, b2_ref, o_ref):
    # Linear1: [TB, 512] @ [512, 128] -> f32 accumulate on the MXU.
    h = jnp.dot(x_ref[...], w1_ref[...], preferred_element_type=jnp.float32)
    # Bias + ReLU on the VPU (padded lanes stay exactly 0: zero cols + ReLU(0)=0).
    h = jnp.maximum(h + b1_ref[...], 0.0)
    # Dropout(0.25) -> identity at inference time.
    # Linear2: [TB, 128] @ [128, 128] -> f32 accumulate.  h is cast to the
    # weight compute dtype so this dot also runs on the fast bf16 MXU path
    # when bf16 weights are supplied.
    out = jnp.dot(h.astype(w2_ref.dtype), w2_ref[...],
                  preferred_element_type=jnp.float32)
    o_ref[...] = (out + b2_ref[...]).astype(o_ref.dtype)


def pad_params(w1, b1, w2, b2, compute_dtype=jnp.bfloat16):
    """One-time lane-dense zero padding (100->128, 10->128) + compute-dtype cast.

    Hoisted out of the per-call forward (perf review): avoids 4 scatter ops +
    HBM round-trips on every call.  Zero pad rows/cols + ReLU(0)=0 keep results
    identical to the unpadded module after slicing back to [:, :10].
    Biases stay f32 (they are added to the f32 accumulator).
    """
    w1p = jnp.zeros((D_IN, HIDDEN_P), compute_dtype).at[:, :HIDDEN].set(
        w1.astype(compute_dtype))
    b1p = jnp.zeros((1, HIDDEN_P), jnp.float32).at[:, :HIDDEN].set(
        b1.reshape(1, HIDDEN).astype(jnp.float32))
    w2p = jnp.zeros((HIDDEN_P, OUT_P), compute_dtype).at[:HIDDEN, :OUT].set(
        w2.astype(compute_dtype))
    b2p = jnp.zeros((1, OUT_P), jnp.float32).at[:, :OUT].set(
        b2.reshape(1, OUT).astype(jnp.float32))
    return w1p, b1p, w2p, b2p


@functools.partial(jax.jit, static_argnames=("block_b",))
def classifier_forward(x, w1p, b1p, w2p, b2p, *, block_b=1024):
    """x: [B, 512]; padded params from pad_params(). Returns [B, 10] in x.dtype."""
    B, d_in = x.shape
    assert d_in == D_IN

    compute_dtype = w1p.dtype
    out_dtype = x.dtype
    c_isz = jnp.dtype(compute_dtype).itemsize
    o_isz = jnp.dtype(out_dtype).itemsize

    # Stream x in the compute dtype.  Ideally the caller already supplies x in
    # this dtype (e.g. bf16 backbone features) so this is a no-op and the HBM
    # x stream — the dominant traffic — is halved.
    xs = x.astype(compute_dtype)

    # --- Batch tiling.
    #  * sublane minimum: 8 rows for 32-bit dtypes, 16 for 16-bit packed dtypes.
    #  * No jnp.pad of x: Pallas masks the ragged last block.  Rows are
    #    independent, so garbage in the padded tail never touches valid rows,
    #    and its out-of-bounds stores are dropped.
    sub = 16 if c_isz == 2 else 8
    tb = min(block_b, _round_up(B, sub))
    # Keep >= 2 grid steps when the batch allows it so the "parallel" axis can
    # be sharded across v7x's two TensorCores (no-op on single-TC v5e/v6e).
    if B > sub:
        tb = min(tb, max(sub, _round_up((B + 1) // 2, sub)))
    grid = (pl.cdiv(B, tb),)

    # --- VMEM budget: double-buffered x/out tiles + resident weights/biases,
    #     plus compiler headroom.  Stays well under v7x's 64 MiB per-TC VMEM.
    vmem_bytes = 2 * (tb * D_IN * c_isz + tb * OUT_P * o_isz
                      + D_IN * HIDDEN_P * c_isz + HIDDEN_P * OUT_P * c_isz
                      + (HIDDEN_P + OUT_P) * 4)
    vmem_limit = int(min(max(vmem_bytes + (4 << 20), 16 << 20), 32 << 20))

    flops = 2 * B * (D_IN * HIDDEN_P + HIDDEN_P * OUT_P)
    bytes_accessed = (B * D_IN * c_isz
                      + (D_IN * HIDDEN_P + HIDDEN_P * OUT_P) * c_isz
                      + (HIDDEN_P + OUT_P) * 4
                      + B * OUT_P * o_isz)

    out = pl.pallas_call(
        classifier_kernel,
        out_shape=jax.ShapeDtypeStruct((B, OUT_P), out_dtype),
        grid=grid,
        in_specs=[
            pl.BlockSpec((tb, D_IN), lambda i: (i, 0)),          # x: streamed per tile
            pl.BlockSpec((D_IN, HIDDEN_P), lambda i: (0, 0)),    # w1: VMEM-resident
            pl.BlockSpec((1, HIDDEN_P), lambda i: (0, 0)),       # b1: VMEM-resident
            pl.BlockSpec((HIDDEN_P, OUT_P), lambda i: (0, 0)),   # w2: VMEM-resident
            pl.BlockSpec((1, OUT_P), lambda i: (0, 0)),          # b2: VMEM-resident
        ],
        out_specs=pl.BlockSpec((tb, OUT_P), lambda i: (i, 0)),
        compiler_params=pltpu.CompilerParams(
            dimension_semantics=("parallel",),
            vmem_limit_bytes=vmem_limit,
        ),
        cost_estimate=pl.CostEstimate(
            flops=flops, transcendentals=0, bytes_accessed=bytes_accessed),
    )(xs, w1p, b1p, w2p, b2p)

    # Slice away the zero-padded output lanes (batch axis was never padded in HBM).
    return out[:, :OUT]


def init_params(key, dtype=jnp.float32):
    """Deterministic init mimicking nn.Linear's uniform(-1/sqrt(fan_in), +)."""
    k1, k2, k3, k4 = jax.random.split(key, 4)
    bound1 = 1.0 / jnp.sqrt(512.0)
    bound2 = 1.0 / jnp.sqrt(100.0)
    w1 = jax.random.uniform(k1, (D_IN, HIDDEN), dtype, -bound1, bound1)
    b1 = jax.random.uniform(k2, (1, HIDDEN), dtype, -bound1, bound1)
    w2 = jax.random.uniform(k3, (HIDDEN, OUT), dtype, -bound2, bound2)
    b2 = jax.random.uniform(k4, (1, OUT), dtype, -bound2, bound2)
    return w1, b1, w2, b2


if __name__ == "__main__":
    key = jax.random.PRNGKey(0)
    kx, kp = jax.random.split(key)
    w1, b1, w2, b2 = init_params(kp)

    # --- Test 1: default bf16-streamed path (recommended on v5e/v6e/v7x).
    B = 32
    x_f32 = jax.random.normal(kx, (B, D_IN), dtype=jnp.float32)
    x_bf16 = x_f32.astype(jnp.bfloat16)
    params_bf16 = pad_params(w1, b1, w2, b2, compute_dtype=jnp.bfloat16)
    out = jax.block_until_ready(classifier_forward(x_bf16, *params_bf16))
    assert out.shape == (B, OUT)
    assert out.dtype == jnp.bfloat16

    # Reference with the same bf16-rounded operands, accumulated in f32.
    xf = x_bf16.astype(jnp.float32)
    w1r = w1.astype(jnp.bfloat16).astype(jnp.float32)
    w2r = w2.astype(jnp.bfloat16).astype(jnp.float32)
    ref = jnp.maximum(xf @ w1r + b1.reshape(1, -1), 0.0) @ w2r + b2.reshape(1, -1)
    assert jnp.allclose(out.astype(jnp.float32), ref, atol=3e-2, rtol=3e-2)

    # --- Test 2: f32 path with a ragged batch (exercises the masked last tile).
    B2 = 20
    x2 = jax.random.normal(jax.random.PRNGKey(1), (B2, D_IN), dtype=jnp.float32)
    params_f32 = pad_params(w1, b1, w2, b2, compute_dtype=jnp.float32)
    out2 = jax.block_until_ready(classifier_forward(x2, *params_f32))
    ref2 = jnp.maximum(x2 @ w1 + b1.reshape(1, -1), 0.0) @ w2 + b2.reshape(1, -1)
    assert out2.shape == (B2, OUT)
    assert jnp.allclose(out2, ref2, atol=1e-4, rtol=1e-4)

    print("KERNEL_OK")
</pallas_src>

<mosaic_0001>
module attributes {stable_mosaic.version = 11 : i64} {
  func.func @classifier_kernel(%arg0: i32, %arg1: memref<16x512xbf16, #tpu.memory_space<vmem>>, %arg2: memref<512x128xbf16, #tpu.memory_space<vmem>>, %arg3: memref<1x128xf32, #tpu.memory_space<vmem>>, %arg4: memref<128x128xbf16, #tpu.memory_space<vmem>>, %arg5: memref<1x128xf32, #tpu.memory_space<vmem>>, %arg6: memref<16x128xbf16, #tpu.memory_space<vmem>>) attributes {dimension_semantics = [#tpu.dimension_semantics<parallel>], iteration_bounds = array<i64: 2>, scalar_prefetch = 0 : i64, scratch_operands = 0 : i64, tpu.core_type = #tpu.core_type<tc>, window_params = [{transform_indices = @transform_0, window_bounds = array<i64: 16, 512>}, {pipeline_mode = #tpu.pipeline_mode<synchronous>, transform_indices = @transform_1, window_bounds = array<i64: 512, 128>}, {pipeline_mode = #tpu.pipeline_mode<synchronous>, transform_indices = @transform_2, window_bounds = array<i64: 1, 128>}, {pipeline_mode = #tpu.pipeline_mode<synchronous>, transform_indices = @transform_3, window_bounds = array<i64: 128, 128>}, {pipeline_mode = #tpu.pipeline_mode<synchronous>, transform_indices = @transform_4, window_bounds = array<i64: 1, 128>}, {transform_indices = @transform_5, window_bounds = array<i64: 16, 128>}]} {
    %c0 = arith.constant 0 : index
    %c0_0 = arith.constant 0 : index
    %0 = vector.load %arg1[%c0, %c0_0] : memref<16x512xbf16, #tpu.memory_space<vmem>>, vector<16x512xbf16>
    %c0_1 = arith.constant 0 : index
    %c0_2 = arith.constant 0 : index
    %1 = vector.load %arg2[%c0_1, %c0_2] : memref<512x128xbf16, #tpu.memory_space<vmem>>, vector<512x128xbf16>
    %cst = arith.constant dense<0.000000e+00> : vector<16x128xf32>
    %2 = tpu.matmul %0, %1, %cst {dimension_numbers = #tpu.dot_dimension_numbers<[1], [0], [0], [1], [0, 0, 1, 1], [], []>} : vector<16x512xbf16>, vector<512x128xbf16>, vector<16x128xf32> -> vector<16x128xf32>
    %c0_3 = arith.constant 0 : index
    %c0_4 = arith.constant 0 : index
    %3 = vector.load %arg3[%c0_3, %c0_4] : memref<1x128xf32, #tpu.memory_space<vmem>>, vector<1x128xf32>
    %4 = vector.broadcast %3 : vector<1x128xf32> to vector<16x128xf32>
    %5 = arith.addf %2, %4 : vector<16x128xf32>
    %cst_5 = arith.constant 0.000000e+00 : f32
    %6 = vector.broadcast %cst_5 : f32 to vector<16x128xf32>
    %7 = arith.maximumf %5, %6 : vector<16x128xf32>
    %8 = arith.truncf %7 : vector<16x128xf32> to vector<16x128xbf16>
    %c0_6 = arith.constant 0 : index
    %c0_7 = arith.constant 0 : index
    %9 = vector.load %arg4[%c0_6, %c0_7] : memref<128x128xbf16, #tpu.memory_space<vmem>>, vector<128x128xbf16>
    %cst_8 = arith.constant dense<0.000000e+00> : vector<16x128xf32>
    %10 = tpu.matmul %8, %9, %cst_8 {dimension_numbers = #tpu.dot_dimension_numbers<[1], [0], [0], [1], [0, 0, 1, 1], [], []>} : vector<16x128xbf16>, vector<128x128xbf16>, vector<16x128xf32> -> vector<16x128xf32>
    %c0_9 = arith.constant 0 : index
    %c0_10 = arith.constant 0 : index
    %11 = vector.load %arg5[%c0_9, %c0_10] : memref<1x128xf32, #tpu.memory_space<vmem>>, vector<1x128xf32>
    %12 = vector.broadcast %11 : vector<1x128xf32> to vector<16x128xf32>
    %13 = arith.addf %10, %12 : vector<16x128xf32>
    %14 = arith.truncf %13 : vector<16x128xf32> to vector<16x128xbf16>
    %c0_11 = arith.constant 0 : index
    %c0_12 = arith.constant 0 : index
    %15 = vector.load %arg6[%c0_11, %c0_12] : memref<16x128xbf16, #tpu.memory_space<vmem>>, vector<16x128xbf16>
    tpu.vector_store %arg6[%c0_11, %c0_12], %14 {strides = array<i32>} : memref<16x128xbf16, #tpu.memory_space<vmem>>, vector<16x128xbf16>,
    return
  }
  func.func @transform_0(%arg0: i32) -> (i32, i32) {
    %c0_i32 = arith.constant 0 : i32
    %c0_i32_0 = arith.constant 0 : i32
    return %arg0, %c0_i32 : i32, i32
  }
  func.func @transform_1(%arg0: i32) -> (i32, i32) {
    %c0_i32 = arith.constant 0 : i32
    %c0_i32_0 = arith.constant 0 : i32
    %c0_i32_1 = arith.constant 0 : i32
    return %c0_i32, %c0_i32_0 : i32, i32
  }
  func.func @transform_2(%arg0: i32) -> (i32, i32) {
    %c0_i32 = arith.constant 0 : i32
    %c0_i32_0 = arith.constant 0 : i32
    %c0_i32_1 = arith.constant 0 : i32
    return %c0_i32, %c0_i32_0 : i32, i32
  }
  func.func @transform_3(%arg0: i32) -> (i32, i32) {
    %c0_i32 = arith.constant 0 : i32
    %c0_i32_0 = arith.constant 0 : i32
    %c0_i32_1 = arith.constant 0 : i32
    return %c0_i32, %c0_i32_0 : i32, i32
  }
  func.func @transform_4(%arg0: i32) -> (i32, i32) {
    %c0_i32 = arith.constant 0 : i32
    %c0_i32_0 = arith.constant 0 : i32
    %c0_i32_1 = arith.constant 0 : i32
    return %c0_i32, %c0_i32_0 : i32, i32
  }
  func.func @transform_5(%arg0: i32) -> (i32, i32) {
    %c0_i32 = arith.constant 0 : i32
    %c0_i32_0 = arith.constant 0 : i32
    return %arg0, %c0_i32 : i32, i32
  }
}

</mosaic_0001>

<bundles_post_ra>
// kernel: classifier_forward.1
= control target key start
LH: loop header
LB: loop body
LE: loop exit
PB: predicated region body
PF: predicated region fallthrough
CT: control target
= control target key end

     0   :  { %10 = vsyncpa [#allocation3], 0  ;;  %s1429_s0 = inlined_call_operand.hbm [shape: bf16[32,512], index: 0, kind: input, shape index: {}]   ;;  %s1430_s1 = inlined_call_operand.hbm [shape: bf16[512,128], index: 1, kind: input, shape index: {}]   ;;  %s1431_s2 = inlined_call_operand.vmem [shape: f32[1,128], index: 2, kind: input, shape index: {}]   ;;  %s1432_s3 = inlined_call_operand.hbm [shape: bf16[128,128], index: 3, kind: input, shape index: {}]   ;;  %s1433_s4 = inlined_call_operand.vmem [shape: f32[1,128], index: 4, kind: input, shape index: {}]   ;;  %s1434_s5 = inlined_call_operand.vmem [shape: bf16[32,128], index: 5, kind: output, shape index: {}]  }
   0x1   :  { %12 = vsyncpa [#allocation3 + $0x1], 0 }
   0x2   :  { %13 = vsyncpa [#allocation5], 0  ;;  %s1277_s18 = smov 0   ;;  %s1279_s19 = smov 0  }
   0x3   :  { %s1281_s20 = smov 0   ;;  %s1283_s21 = smov 0  }
   0x4 LB: > { %s858_s22 = sadd.s32 4294967295, %s1236_s21   ;;  %p39_p0 = scmp.ne.s32.totalorder %s1228_s19, %s1224_s18  ;;  %s1236_s21 = sphi %s1283_s21, %s1451_s21   ;;  %s1232_s20 = sphi %s1281_s20, %s1450_s20   ;;  %s1228_s19 = sphi %s1279_s19, %s1449_s19   ;;  %s1224_s18 = sphi %s1277_s18, %s1448_s18  }
   0x5   : > { %p1299_p1 = scmp.eq.s32.totalorder %s858_s22, 0  ;;  %p860_p2 = scmp.ge.s32.totalorder %s1236_s21, 1 }
   0x6   : > { %p160_p3 = scmp.lt.s32.totalorder %s1236_s21, 3  ;;  %s1238_s26 = smov [#allocation4]  }
   0x7   : > { %s1439_s23 = scalar_select %p1299_p1, 1, 0 }
   0x8   : > { %p1307_p4 = por %p1299_p1, %p39_p0  ;;  %p1311_p5 = pnand %p860_p2, %p160_p3 }
   0x9   : > { %s172_s27 = sshll.u32 %s1238_s26, 4  ;;  %s1239_s29 = smov [#allocation6]   ;;  %s173_s27 = int_to_ptr.vmem [resolvable:$true] %s172_s27 }
   0xa   : > { %s1440_s24 = scalar_select %p1307_p4, 1, 0 }
   0xb   : > { %s1441_s25 = scalar_select %p1311_p5, 1, 0 }
   0xc   : > { %p1016_p6 = pneg %p1311_p5  ;;  %s188_s30 = sshll.u32 %s1239_s29, 4  ;;  %s189_s30 = int_to_ptr.vmem [resolvable:$true] %s188_s30 }
   0xd   : > { %s1129_s6 = scalar_lea.vmem %s173_s27, 4096  ;;  %p1137_p12 = scmp.lt.s32.totalorder %s173_s27, %s173_s27 }
   0xe   : > { %p1319_p7 = pnand %p1016_p6, %p1299_p1  ;;  %p1130_p9 = scmp.ne.s32.totalorder %s173_s27, %s1129_s6 }
   0xf   : > { %p1138_p13 = scmp.lt.s32.totalorder %s1129_s6, %s1129_s6 }
  0x10   : > { %p1120_p8 = pneg %p1319_p7 }
  0x11   : > { %p1139_p0 = por %p1138_p13, %p1137_p12 }
  0x12   : > { %p1132_p10 = pnand %p1130_p9, %p1120_p8 }
  0x14   : > { %p1133_p11 = pneg %p1132_p10 }
  0x16   : > { %p1140_p2 = pnand %p1139_p0, %p1133_p11 }
  0x18   : > { %1143 = shalt.err (!%p1140_p2)
}
  0x19   : > { %s1240_s7 = smov 64   ;;  %s1241_s8 = smov 4  }
  0x1a   : > { %1019 = dma.hbm_to_vmem [thread:$0]  (!%p1319_p7), %s1430_s1, 4096, %s173_s27, [#allocation5], %s1240_s7, %s1240_s7, %s1241_s8  }
  0x1b   : > { %s1155_s11 = scalar_lea.vmem %s189_s30, 1024  ;;  %p1163_p10 = scmp.lt.s32.totalorder %s189_s30, %s189_s30 }
  0x1c   : > { %p1156_p3 = scmp.ne.s32.totalorder %s189_s30, %s1155_s11  ;;  %p1164_p1 = scmp.lt.s32.totalorder %s1155_s11, %s1155_s11 }
  0x1e   : > { %p1158_p6 = pnand %p1156_p3, %p1120_p8  ;;  %p1165_p12 = por %p1164_p1, %p1163_p10 }
  0x20   : > { %p1159_p9 = pneg %p1158_p6 }
  0x22   : > { %p1166_p11 = pnand %p1165_p12, %p1159_p9 }
  0x24   : > { %1169 = shalt.err (!%p1166_p11)
}
  0x25   : > { %1022 = dma.hbm_to_vmem [thread:$0]  (!%p1319_p7), %s1432_s3, 1024, %s189_s30, [#allocation5], %s1240_s7, %s1240_s7, %s1241_s8  }
  0x26   : > { %s1342_s14 = sadd.s32 1, %s1236_s21   ;;  %s26_s15 = sadd.s32 1, %s1232_s20 }
  0x27   : > { %s23_s16 = ssub.s32 %s1236_s21, %s1342_s14  ;;  %p33_p1 = scmp.ne.s32.totalorder %s1232_s20, %s1228_s19 }
  0x28   : > { %p24_p8 = scmp.eq.s32.totalorder %s23_s16, 0  ;;  %p34_p13 = scmp.eq.s32.totalorder %s1236_s21, 0 }
  0x29   : > { %p1029_p0 = scmp.lt.s32.totalorder %s1236_s21, 2  ;;  %s205_s17 = sand.u32 1, %s1232_s20  }
  0x2a   : > { %s1353_s18 = scalar_select %p24_p8, %s1232_s20, %s26_s15  }
  0x2b   : > { %p35_p2 = por %p34_p13, %p33_p1  ;;  %s864_s26 = sshll.u32 %s205_s17, 5 }
  0x2c   : > { %s925_s27 = sshll.u32 %s1236_s21, 9  ;;  %s209_s30 = scalar_lea.vmem [#allocation2], %s864_s26 }
  0x2d   : > { %s1359_s6 = scalar_lea.hbm %s1429_s0, %s925_s27  ;;  %s217_s7 = sshll.u32 %s209_s30, 4  ;;  %s1365_s7 = int_to_ptr.vmem [resolvable:$true] %s217_s7 }
  0x2e   : > { %p1361_p7 = pnand %p1029_p0, %p35_p2  ;;  %s1367_s9 = scalar_lea.sflag [#allocation3], %s205_s17 }
  0x2f   : > { %s1170_s10 = scalar_lea.hbm %s1359_s6, 512  ;;  %s1175_s13 = scalar_lea.hbm %s1429_s0, 1024 }
  0x30   : > { %p1171_p3 = scmp.ne.s32.totalorder %s1359_s6, %s1170_s10  ;;  %p1172_p6 = pneg %p1361_p7 }
  0x31   : > { %p1176_p12 = scmp.lt.s32.totalorder %s1359_s6, %s1429_s0  ;;  %p1177_p11 = scmp.lt.s32.totalorder %s1175_s13, %s1170_s10 }
  0x32   : > { %p1173_p9 = pnand %p1172_p6, %p1171_p3 }
  0x33   : > { %p1178_p1 = por %p1177_p11, %p1176_p12 }
  0x34   : > { %p1174_p10 = pneg %p1173_p9 }
  0x36   : > { %p1179_p8 = pnand %p1178_p1, %p1174_p10 }
  0x38   : > { %1182 = shalt.err (!%p1179_p8)
}
  0x39   : > { %s1183_s17 = scalar_lea.vmem %s1365_s7, 512  ;;  %s1242_s26 = smov [#allocation2]  }
  0x3a   : > { %p1184_p13 = scmp.ne.s32.totalorder %s1365_s7, %s1183_s17  ;;  %s1188_s27 = sshll.u32 %s1242_s26, 4  ;;  %s1189_s27 = int_to_ptr.vmem [resolvable:$false] %s1188_s27 }
  0x3b   : > { %s1190_s28 = scalar_lea.vmem %s1189_s27, 1024  ;;  %p1191_p3 = scmp.lt.s32.totalorder %s1365_s7, %s1189_s27 }
  0x3c   : > { %p1186_p0 = pnand %p1184_p13, %p1172_p6  ;;  %p1192_p9 = scmp.lt.s32.totalorder %s1190_s28, %s1183_s17 }
  0x3e   : > { %p1187_p2 = pneg %p1186_p0  ;;  %p1193_p4 = por %p1192_p9, %p1191_p3 }
  0x40   : > { %p1194_p5 = pnand %p1193_p4, %p1187_p2 }
  0x42   : > { %1197 = shalt.err (!%p1194_p5)
}
  0x43   : > { %s1243_s29 = smov 256   ;;  %s1244_s30 = smov 16  }
  0x44   : > { %1026 = dma.hbm_to_vmem [thread:$0]  (!%p1361_p7), %s1359_s6, 512, %s1365_s7, %s1367_s9, %s1243_s29, %s1243_s29, %s1244_s30  }
  0x45   : > { %p1444_p6 = scmp.ne.s32.totalorder %s1441_s25, 0 }
  0x46   : > { %s231_s10 = sand.u32 (!%p1444_p6), 1, %s1228_s19   ;;  %p1445_p4 = scmp.ne.s32.totalorder (!%p1444_p6), %s1440_s24, 0 }
  0x47   : > { %229 = sbr.rel (%p1444_p6) target bundleno = 525 (0x20d), region = 40  ;;  %s869_s11 = sshll.u32 (!%p1444_p6), %s231_s10, 5 }
  0x48   : > { %s232_s12 = scalar_lea.sflag (!%p1444_p6), [#allocation3], %s231_s10  ;;  %s1391_s13 = scalar_lea.vmem (!%p1444_p6), [#allocation2], %s869_s11 }
  0x4c   : > { %1215 = dma.done.wait (%p1445_p4), %s232_s12, 512  }
  0x4d   : > { %1217 = vsyncadd (%p1445_p4), %s232_s12, 4294966784  ;;  %p1446_p5 = scmp.ne.s32.totalorder %s1439_s23, 0 }
  0x4f   : > { %1219 = dma.done.wait (%p1446_p5), [#allocation5], 5120  }
  0x50   : > { %1221 = vsyncadd (%p1446_p5), [#allocation5], 4294962176  ;;  %v1072_v0 = vld [vmem:[#allocation4 + $0x78] sm:$0xff]   ;;  %v1076_v4 = vld [vmem:[#allocation4 + $0x70] sm:$0xff]   ;;  %v1245_v34 = vmov 0.0   ;;  %vm1246_vm0 = vmmov 0  }
  0x51   : > { %v1073_v1 = vld [vmem:[#allocation4 + $0xf8] sm:$0xff]   ;;  %933 = vmatprep.subr.bf16.mxu0 %v1072_v0  ;;  %v1077_v5 = vld [vmem:[#allocation4 + $0xf0] sm:$0xff]   ;;  %v1080_v8 = vld [vmem:[#allocation4 + $0x68] sm:$0xff]   ;;  %s872_s25 = sshll.u32 %s858_s22, 1 }
  0x52   : > { %v1074_v2 = vld [vmem:[#allocation4 + $0x38] sm:$0xff]   ;;  %955 = vmatprep.subr.bf16.mxu1 %v1073_v1  ;;  %v1078_v6 = vld [vmem:[#allocation4 + $0x30] sm:$0xff]   ;;  %v1081_v9 = vld [vmem:[#allocation4 + $0xe8] sm:$0xff]   ;;  %p272_p7 = scmp.lt.s32.totalorder %s872_s25, 3 }
  0x53   : > { %v1075_v3 = vld [vmem:[#allocation4 + $0xb8] sm:$0xff]   ;;  %934 = vmatpush3.bf16.msra.mxu0 %v1074_v2  ;;  %v1079_v7 = vld [vmem:[#allocation4 + $0xb0] sm:$0xff]   ;;  %v1082_v10 = vld [vmem:[#allocation4 + $0x28] sm:$0xff]  }
  0x54   : > { %956 = vmatpush3.bf16.msra.mxu1 %v1075_v3  ;;  %935 = vmatprep.subr.bf16.mxu0 %v1076_v4  ;;  %v1083_v11 = vld [vmem:[#allocation4 + $0xa8] sm:$0xff]   ;;  %v1084_v12 = vld [vmem:[#allocation4 + $0x60] sm:$0xff]   ;;  %v1088_v16 = vld [vmem:[#allocation4 + $0x58] sm:$0xff]   ;;  %s1453_s25 = smov (!%p272_p7, %s872_s25), 3 }
  0x55   : > { %957 = vmatprep.subr.bf16.mxu1 %v1077_v5  ;;  %v1085_v13 = vld [vmem:[#allocation4 + $0xe0] sm:$0xff]   ;;  %v1089_v17 = vld [vmem:[#allocation4 + $0xd8] sm:$0xff]   ;;  %v1092_v20 = vld [vmem:[#allocation4 + $0x50] sm:$0xff]   ;;  %s873_s8 = sshll.u32 %s1453_s25, 2 }
  0x56   : > { %v1086_v14 = vld [vmem:[#allocation4 + $0x20] sm:$0xff]   ;;  %v1090_v18 = vld [vmem:[#allocation4 + $0x18] sm:$0xff]   ;;  %v1093_v21 = vld [vmem:[#allocation4 + $0xd0] sm:$0xff]   ;;  %s275_s16 = scalar_lea.vmem %s1434_s5, %s873_s8 }
  0x57   : > { %936 = vmatpush3.bf16.msra.mxu0 %v1078_v6  ;;  %v1087_v15 = vld [vmem:[#allocation4 + $0xa0] sm:$0xff]   ;;  %v1091_v19 = vld [vmem:[#allocation4 + $0x98] sm:$0xff]   ;;  %v1094_v22 = vld [vmem:[#allocation4 + $0x10] sm:$0xff]  }
  0x58   : > { %958 = vmatpush3.bf16.msra.mxu1 %v1079_v7  ;;  %937 = vmatprep.subr.bf16.mxu0 %v1080_v8  ;;  %v1095_v23 = vld [vmem:[#allocation4 + $0x90] sm:$0xff]   ;;  %v1096_v24 = vld [vmem:[#allocation4 + $0x48] sm:$0xff]   ;;  %v1100_v28 = vld [vmem:[#allocation4 + $0x40] sm:$0xff]  }
  0x59   : > { %959 = vmatprep.subr.bf16.mxu1 %v1081_v9  ;;  %v1097_v25 = vld [vmem:[#allocation4 + $0xc8] sm:$0xff]   ;;  %v1101_v29 = vld [vmem:[#allocation4 + $0xc0] sm:$0xff]   ;;  %v1110_v37 = vld [vmem:[#allocation6 + $0x38] sm:$0xff]  }
  0x5a   : > { %v1098_v26 = vld [vmem:[#allocation4 + $0x8] sm:$0xff]   ;;  %v1102_v30 = vld [vmem:[#allocation4] sm:$0xff]   ;;  %v1111_v38 = vld [vmem:[#allocation6 + $0x30] sm:$0xff]  }
  0x5b   : > { %938 = vmatpush3.bf16.msra.mxu0 %v1082_v10  ;;  %v1099_v27 = vld [vmem:[#allocation4 + $0x88] sm:$0xff]   ;;  %v1103_v31 = vld [vmem:[#allocation4 + $0x80] sm:$0xff]   ;;  %v1114_v41 = vld [vmem:[#allocation6 + $0x18] sm:$0xff]  }
  0x5c   : > { %960 = vmatpush3.bf16.msra.mxu1 %v1083_v11  ;;  %939 = vmatprep.subr.bf16.mxu0 %v1084_v12  ;;  %v1104_v32 = vld [vmem:[%s1391_s13] ss:$16 sps:$4 sm:$0xff]   ;;  %v1106_v33 = vld [vmem:[%s1391_s13 + $0x4] ss:$16 sps:$4 sm:$0xff]   ;;  %v1107_v35 = vld [vmem:[%s1391_s13 + $0x8] ss:$16 sps:$4 sm:$0xff]  }
  0x5d   : > { %961 = vmatprep.subr.bf16.mxu1 %v1085_v13  ;;  %v1109_v36 = vld [vmem:[%s1391_s13 + $0xc] ss:$16 sps:$4 sm:$0xff]   ;;  %597 = vmatprep.mubr.bf16.mxu0 %v1106_v33  ;;  %v1113_v40 = vld [vmem:[#allocation6 + $0x20] sm:$0xff]   ;;  %v1115_v42 = vld [vmem:[#allocation6 + $0x10] sm:$0xff]  }
  0x5e   : > { %638 = vmatprep.mubr.bf16.mxu1 %v1109_v36  ;;  %v1112_v39 = vld [vmem:[#allocation6 + $0x28] sm:$0xff]   ;;  %v1117_v44 = vld [vmem:[#allocation6] sm:$0xff]  }
  0x5f   : > { %940 = vmatpush3.bf16.msra.mxu0 %v1086_v14  ;;  %v1116_v43 = vld [vmem:[#allocation6 + $0x8] sm:$0xff]   ;;  %v874_v47 = vld [vmem:[%s1431_s2] ss:$0 sm:$0xff] }
  0x60   : > { %962 = vmatpush3.bf16.msra.mxu1 %v1087_v15  ;;  %941 = vmatprep.subr.bf16.mxu0 %v1088_v16  ;;  %v911_v2 = vld [vmem:[%s1433_s4] ss:$0 sm:$0xff] }
  0x61   : > { %963 = vmatprep.subr.bf16.mxu1 %v1089_v17 }
  0x63   : > { %942 = vmatpush3.bf16.msra.mxu0 %v1090_v18 }
  0x64   : > { %964 = vmatpush3.bf16.msra.mxu1 %v1091_v19  ;;  %943 = vmatprep.subr.bf16.mxu0 %v1092_v20 }
  0x65   : > { %965 = vmatprep.subr.bf16.mxu1 %v1093_v21 }
  0x67   : > { %944 = vmatpush3.bf16.msra.mxu0 %v1094_v22 }
  0x68   : > { %966 = vmatpush3.bf16.msra.mxu1 %v1095_v23  ;;  %945 = vmatprep.subr.bf16.mxu0 %v1096_v24 }
  0x69   : > { %967 = vmatprep.subr.bf16.mxu1 %v1097_v25 }
  0x6b   : > { %946 = vmatpush3.bf16.msra.mxu0 %v1098_v26 }
  0x6c   : > { %968 = vmatpush3.bf16.msra.mxu1 %v1099_v27  ;;  %947 = vmatprep.subr.bf16.mxu0 %v1100_v28 }
  0x6d   : > { %969 = vmatprep.subr.bf16.mxu1 %v1101_v29 }
  0x6f   : > { %948 = vmatpush3.bf16.msra.mxu0 %v1102_v30 }
  0x70   : > { %970 = vmatpush3.bf16.msra.mxu1 %v1103_v31  ;;  %986 = vmatprep.subr.bf16.mxu0 %v1245_v34 }
  0x72   : > { %598 = vmatmul.mubr.bf16.vlgmr.msra.gmra.mxu0 %v1104_v32 }
  0x73   : > { %639 = vmatmul.mubr.bf16.vlgmr.msra.gmra.mxu1 %v1107_v35  ;;  %987 = vmatpush3.bf16.msra.mxu0 %v1110_v37 }
  0x74   : > { %988 = vmatprep.subr.bf16.mxu0 %v1245_v34  ;;  %1002 = vmatprep.mubr.msk.bf16.mxu0 %vm1246_vm0, %v1245_v34 }
  0x77   : > { %989 = vmatpush3.bf16.msra.mxu0 %v1111_v38 }
  0x78   : > { %990 = vmatprep.subr.bf16.mxu0 %v1245_v34 }
  0x7b   : > { %991 = vmatpush3.bf16.msra.mxu0 %v1112_v39 }
  0x7c   : > { %992 = vmatprep.subr.bf16.mxu0 %v1245_v34 }
  0x7f   : > { %993 = vmatpush3.bf16.msra.mxu0 %v1113_v40 }
  0x80   : > { %994 = vmatprep.subr.bf16.mxu0 %v1245_v34 }
  0x83   : > { %995 = vmatpush3.bf16.msra.mxu0 %v1114_v41 }
  0x84   : > { %996 = vmatprep.subr.bf16.mxu0 %v1245_v34 }
  0x87   : > { %997 = vmatpush3.bf16.msra.mxu0 %v1115_v42 }
  0x88   : > { %998 = vmatprep.subr.bf16.mxu0 %v1245_v34 }
  0x8b   : > { %999 = vmatpush3.bf16.msra.mxu0 %v1116_v43 }
  0x8c   : > { %1000 = vmatprep.subr.bf16.mxu0 %v1245_v34 }
  0x8f   : > { %1001 = vmatpush3.bf16.msra.mxu0 %v1117_v44 }
 0x132   : > { %v949_v45 = vpop.f32.mrf.mxu0 }
 0x133   : > { %v971_v46 = vpop.f32.mrf.mxu1 }
 0x134   : > { %v950_v48 = vpop.f32.mrf.mxu0 }
 0x135   : > { %v951_v49 = vadd.f32 %v950_v48, %v949_v45  ;;  %v972_v50 = vpop.f32.mrf.mxu1 }
 0x136   : > { %v952_v51 = vpop.f32.mrf.mxu0  ;;  %v973_v55 = vadd.f32 %v972_v50, %v971_v46 }
 0x137   : > { %v600_v52 = vadd.f32 %v951_v49, %v874_v47  ;;  %v974_v53 = vpop.f32.mrf.mxu1 }
 0x138   : > { %v953_v54 = vpop.f32.mrf.mxu0 }
 0x139   : > { %v954_v56 = vadd.f32 %v953_v54, %v952_v51  ;;  %v975_v57 = vpop.f32.mrf.mxu1  ;;  %v641_v58 = vadd.f32 %v973_v55, %v600_v52 }
 0x13a   : > { %v976_v60 = vadd.f32 %v975_v57, %v974_v53 }
 0x13b   : > { %v603_v59 = vadd.f32 %v954_v56, %v874_v47  ;;  %v647_v62 = vmax.f32 %v641_v58, 0.0 }
 0x13d   : > { %v644_v61 = vadd.f32 %v976_v60, %v603_v59 }
 0x13f   : > { %v648_v63 = vmax.f32 %v644_v61, 0.0 }
 0x141   : > { %v649_v0 = vpack.c.bf16 %v648_v63, %v647_v62 }
 0x143   : > { %1003 = vmatmul.mubr.bf16.vlgmr.msra.gmra.mxu0 %v649_v0 }
 0x203   : > { %v755_v1 = vpop.f32.mrf.mxu0 }
 0x204   : > { %v756_v5 = vadd.f32 %v911_v2, %v755_v1 }
 0x205   : > { %v1004_v3 = vpop.f32.mrf.mxu0 }
 0x207   : > { %v758_v4 = vpop.f32.mrf.mxu0 }
 0x208   : > { %v759_v6 = vadd.f32 %v911_v2, %v758_v4 }
 0x209   : > { %v1005_v7 = vpop.f32.mrf.mxu0 }
 0x20a   : > { %v931_v8 = vpack.c.bf16 %v759_v6, %v756_v5 }
 0x20c   : > { %932 = vst [vmem:[%s275_s16] sm:$0xff] %v931_v8  }
 0x20d PF: > { %s1447_s21 = smov %s1353_s18  ;;  %p16_p10 = scmp.ge.s32.totalorder %s1342_s14, 4  }
 0x20e   : > { %s1448_s18 = smov %s1228_s19  ;;  %s1449_s19 = smov %s1232_s20 }
 0x20f   : > { %s1450_s20 = smov %s1447_s21  ;;  %s1451_s21 = smov %s1342_s14 }
 0x210   :  { %18 = sbr.rel (!%p16_p10) target bundleno = 4 (0x4), region = 88 }
 0x215   :  { %794 = vsyncpa [#allocation3], 1 }
 0x216   :  { %796 = vsyncpa [#allocation3 + $0x1], 1 }
 0x217   :  { %797 = vsyncpa [#allocation5], 1 }

</bundles_post_ra>
